<compile_context>
chip_gen: v7x
topology: tpu7x:2x2x1
jax: 0.10.0
libtpu: 0.0.40
codegen_flags: <defaults>
</compile_context>

<pallas_src>
import jax
import jax.numpy as jnp
from jax.experimental import pallas as pl
from jax.experimental.pallas import tpu as pltpu


def _round_up(n, m):
    return ((n + m - 1) // m) * m


def prob_kernel(w_ref, x_ref, out_ref):
    # x: {0,1} observations, narrow dtype in HBM; widened only inside VMEM.
    x = x_ref[...].astype(jnp.bfloat16)                       # (tb, D)
    # MXU contraction against the hi/lo bf16 split of the f32 log-odds
    # (lanes 0 and 1 of w_ref; remaining lanes are exactly zero).
    acc = jnp.dot(x, w_ref[...],
                  preferred_element_type=jnp.float32)         # (tb, 128)
    logit = jnp.sum(acc, axis=1, keepdims=True)               # (tb, 1) = hi + lo
    # sigmoid(logit) == num / (num + opp); exp + reciprocal run on the EUP.
    out_ref[...] = pl.reciprocal(1.0 + jnp.exp(-logit), approx=True)
    # TODO(synk): for small D the (tb, 1) output keeps the store slot on
    # masked single-lane vst's; pack 128 row results into lane-dense vregs if
    # profiling ever shows the kernel vst-bound instead of HBM-bound.


def _choose_block_b(B, D, itemsize):
    """Batch tile: ~2 MiB of x per tile, adaptive to D and to B."""
    target_bytes = 2 << 20
    tb = target_bytes // max(1, D * itemsize)
    # Floor of 32 rows (int8 sublane packing) instead of 256 so enormous D
    # still fits every generation's scoped-VMEM default.
    tb = max(32, min(4096, tb))
    # Keep >= 2 grid steps when possible so the "parallel" axis actually
    # splits across v7x's two TensorCores.
    tb = min(tb, _round_up(pl.cdiv(B, 2), 32))
    return _round_up(tb, 32)


def probnetwork_forward(para, x):
    """para: (D,) probabilities; x: (B, D) binary {0,1} -> (B,) float32."""
    B, D = x.shape
    if x.dtype == jnp.bool_:
        # TODO(synk): callers should store x as int8/uint8 so this extra HBM
        # pass never happens; bool is converted here only for safety.
        x = x.astype(jnp.int8)

    # Log-odds weights: tiny (D,) op hoisted out of the grid loop, split into
    # hi/lo bf16 halves so the bf16 MXU path keeps ~f32 accuracy
    # (|w - (hi + lo)| ~ |w| * 2^-18).
    eps = 1e-7
    p = jnp.clip(para.astype(jnp.float32), eps, 1.0 - eps)
    w = jnp.log(p) - jnp.log1p(-p)                             # (D,) f32
    w_hi = w.astype(jnp.bfloat16)
    w_lo = (w - w_hi.astype(jnp.float32)).astype(jnp.bfloat16)
    # Lane-pad to a full 128-lane tile (free on the MXU, avoids odd N=2 shapes).
    w_cols = jnp.pad(jnp.stack([w_hi, w_lo], axis=1), ((0, 0), (0, 126)))

    itemsize = x.dtype.itemsize
    tb = _choose_block_b(B, D, itemsize)
    grid = (pl.cdiv(B, tb),)   # no wrapper-side pad: boundary blocks are
                               # partially read / write-masked by Pallas.

    # VMEM budget: sized from the actual tile so double-buffering survives on
    # v5e (16 MiB default scoped) and we stay well under v7x's 64 MiB physical.
    x_tile = tb * D * itemsize
    vmem_need = (2 * x_tile            # double-buffered x tiles
                 + 2 * tb * D * 2      # bf16 widen of x (with slack)
                 + tb * 128 * 4        # f32 MXU accumulator
                 + 2 * D * 128 * 2     # resident log-odds columns
                 + (2 << 20))          # misc compiler scratch slack
    vmem_limit = int(min(48 << 20, max(32 << 20, vmem_need)))

    out = pl.pallas_call(
        prob_kernel,
        out_shape=jax.ShapeDtypeStruct((B, 1), jnp.float32),
        grid=grid,
        in_specs=[
            pl.BlockSpec((D, 128), lambda i: (0, 0)),   # w: VMEM-resident
            pl.BlockSpec((tb, D), lambda i: (i, 0)),    # x: pipelined batch tiles
        ],
        out_specs=pl.BlockSpec((tb, 1), lambda i: (i, 0)),
        compiler_params=pltpu.CompilerParams(
            dimension_semantics=("parallel",),          # v7x: shard across 2 TCs
            vmem_limit_bytes=vmem_limit),
    )(w_cols, x)
    return out[:, 0]


def probnetwork_reference(para, x):
    """Direct translation of the PyTorch forward (product form)."""
    xf = x.astype(jnp.float32)
    mask = xf > 0.5
    p = para.astype(jnp.float32)[None, :]
    num = jnp.prod(jnp.where(mask, p, 1.0), axis=1)
    opp = jnp.prod(jnp.where(mask, 1.0 - p, 1.0), axis=1)
    return num / (num + opp)


if __name__ == "__main__":
    key = jax.random.PRNGKey(0)
    k_para, k_x = jax.random.split(key)

    B, D = 48, 128  # B not a multiple of the tile -> exercises boundary masking
    # deterministic "input_prob" parameter, strictly inside (0, 1)
    para = jax.random.uniform(k_para, (D,), dtype=jnp.float32,
                              minval=0.05, maxval=0.95)
    # binary observation matrix kept in the narrowest practical dtype (1 B/elem)
    x = jax.random.bernoulli(k_x, p=0.5, shape=(B, D)).astype(jnp.int8)

    out = probnetwork_forward(para, x)   # tb=32 here -> grid=(2,), last block partial
    out = jax.block_until_ready(out)

    ref = probnetwork_reference(para, x)
    assert out.shape == (B,), out.shape
    assert bool(jnp.all(jnp.isfinite(out))), "non-finite output"
    # Error budget: hi/lo bf16 weight split ~1e-4 on the logit, EUP approx
    # reciprocal ~1e-3 relative on the output; real bugs are O(0.1-1).
    assert bool(jnp.allclose(out, ref, rtol=5e-3, atol=1e-6)), (out, ref)

    print("KERNEL_OK")
</pallas_src>

<mosaic_0001>
module attributes {stable_mosaic.version = 11 : i64} {
  func.func @prob_kernel(%arg0: i32, %arg1: memref<128x128xbf16, #tpu.memory_space<vmem>>, %arg2: memref<32x128xi8, #tpu.memory_space<vmem>>, %arg3: memref<32x1xf32, #tpu.memory_space<vmem>>) attributes {dimension_semantics = [#tpu.dimension_semantics<parallel>], iteration_bounds = array<i64: 2>, scalar_prefetch = 0 : i64, scratch_operands = 0 : i64, tpu.core_type = #tpu.core_type<tc>, window_params = [{pipeline_mode = #tpu.pipeline_mode<synchronous>, transform_indices = @transform_0, window_bounds = array<i64: 128, 128>}, {transform_indices = @transform_1, window_bounds = array<i64: 32, 128>}, {transform_indices = @transform_2, window_bounds = array<i64: 32, 1>}]} {
    %c0 = arith.constant 0 : index
    %c0_0 = arith.constant 0 : index
    %0 = vector.load %arg2[%c0, %c0_0] : memref<32x128xi8, #tpu.memory_space<vmem>>, vector<32x128xi8>
    %1 = arith.sitofp %0 : vector<32x128xi8> to vector<32x128xbf16>
    %c0_1 = arith.constant 0 : index
    %c0_2 = arith.constant 0 : index
    %2 = vector.load %arg1[%c0_1, %c0_2] : memref<128x128xbf16, #tpu.memory_space<vmem>>, vector<128x128xbf16>
    %cst = arith.constant dense<0.000000e+00> : vector<32x128xf32>
    %3 = tpu.matmul %1, %2, %cst {dimension_numbers = #tpu.dot_dimension_numbers<[1], [0], [0], [1], [0, 0, 1, 1], [], []>} : vector<32x128xbf16>, vector<128x128xbf16>, vector<32x128xf32> -> vector<32x128xf32>
    %cst_3 = arith.constant dense<0.000000e+00> : vector<32xf32>
    %4 = vector.multi_reduction <add>, %3, %cst_3 [1] : vector<32x128xf32> to vector<32xf32>
    %5 = vector.shape_cast %4 : vector<32xf32> to vector<32x1xf32>
    %cst_4 = arith.constant 0.000000e+00 : f32
    %6 = vector.broadcast %cst_4 : f32 to vector<32x1xf32>
    %7 = arith.subf %6, %5 : vector<32x1xf32>
    %8 = math.exp %7 : vector<32x1xf32>
    %cst_5 = arith.constant 1.000000e+00 : f32
    %9 = vector.broadcast %cst_5 : f32 to vector<32x1xf32>
    %10 = arith.addf %9, %8 : vector<32x1xf32>
    %11 = tpu.reciprocal %10 {approx = true} : vector<32x1xf32> -> vector<32x1xf32>
    %c0_6 = arith.constant 0 : index
    %c0_7 = arith.constant 0 : index
    %12 = vector.load %arg3[%c0_6, %c0_7] : memref<32x1xf32, #tpu.memory_space<vmem>>, vector<32x1xf32>
    tpu.vector_store %arg3[%c0_6, %c0_7], %11 {strides = array<i32>} : memref<32x1xf32, #tpu.memory_space<vmem>>, vector<32x1xf32>,
    return
  }
  func.func @transform_0(%arg0: i32) -> (i32, i32) {
    %c0_i32 = arith.constant 0 : i32
    %c0_i32_0 = arith.constant 0 : i32
    %c0_i32_1 = arith.constant 0 : i32
    return %c0_i32, %c0_i32_0 : i32, i32
  }
  func.func @transform_1(%arg0: i32) -> (i32, i32) {
    %c0_i32 = arith.constant 0 : i32
    %c0_i32_0 = arith.constant 0 : i32
    return %arg0, %c0_i32 : i32, i32
  }
  func.func @transform_2(%arg0: i32) -> (i32, i32) {
    %c0_i32 = arith.constant 0 : i32
    %c0_i32_0 = arith.constant 0 : i32
    return %arg0, %c0_i32 : i32, i32
  }
}

</mosaic_0001>

<bundles_post_ra>
// kernel: tpu_custom_call.1
= control target key start
LH: loop header
LB: loop body
LE: loop exit
PB: predicated region body
PF: predicated region fallthrough
CT: control target
= control target key end

     0   :  { %7 = vsyncpa [#allocation3], 0  ;;  %s1205_s0 = inlined_call_operand.hbm [shape: bf16[128,128], index: 0, kind: input, shape index: {}]   ;;  %s1206_s1 = inlined_call_operand.hbm [shape: s8[48,128], index: 1, kind: input, shape index: {}]   ;;  %s1207_s2 = inlined_call_operand.vmem [shape: f32[48,1], index: 2, kind: output, shape index: {}]  }
   0x1   :  { %8 = vsyncpa [#allocation5], 0 }
   0x2   :  { %10 = vsyncpa [#allocation5 + $0x1], 0  ;;  %s999_s9 = smov 0   ;;  %s1001_s10 = smov 0  }
   0x3   :  { %s1003_s11 = smov 0   ;;  %s1005_s12 = smov 0  }
   0x4 LB: > { %s1018_s13 = sadd.s32 4294967295, %s944_s12   ;;  %s1021_s14 = sadd.s32 1, %s944_s12   ;;  %s944_s12 = sphi %s1005_s12, %s1228_s12   ;;  %s940_s11 = sphi %s1003_s11, %s1227_s11   ;;  %s936_s10 = sphi %s1001_s10, %s1226_s10   ;;  %s932_s9 = sphi %s999_s9, %s1225_s9  }
   0x5   : > { %s41_s15 = ssub.s32 %s944_s12, %s1021_s14  ;;  %s44_s16 = sadd.s32 1, %s940_s11 }
   0x6   : > { %p42_p0 = scmp.eq.s32.totalorder %s41_s15, 0  ;;  %p51_p1 = scmp.ne.s32.totalorder %s940_s11, %s936_s10 }
   0x7   : > { %p52_p2 = scmp.eq.s32.totalorder %s944_s12, 0  ;;  %p57_p3 = scmp.ne.s32.totalorder %s936_s10, %s932_s9 }
   0x8   : > { %s1031_s17 = scalar_select %p42_p0, %s940_s11, %s44_s16  }
   0x9   : > { %p1033_p4 = por %p52_p2, %p51_p1  ;;  %p1208_p5 = scmp.eq.s32.totalorder %s1018_s13, 0 }
   0xa   : > { %p81_p6 = scmp.eq.s32.totalorder %s1018_s13, 1  ;;  %p607_p7 = scmp.ge.s32.totalorder %s944_s12, 1 }
   0xb   : > { %s1211_s18 = scalar_select %p1033_p4, 1, 0 }
   0xc   : > { %p1042_p8 = por %p1208_p5, %p57_p3  ;;  %p94_p9 = scmp.lt.s32.totalorder %s944_s12, 3 }
   0xd   : > { %p1047_p10 = por %p81_p6, %p51_p1  ;;  %s978_s22 = smov [#allocation2]  }
   0xe   : > { %s1212_s19 = scalar_select %p1042_p8, 1, 0 }
   0xf   : > { %s1213_s20 = scalar_select %p1047_p10, 1, 0 }
  0x10   : > { %p1051_p11 = pnand %p607_p7, %p94_p9  ;;  %s106_s23 = sshll.u32 %s978_s22, 4  ;;  %s107_s23 = int_to_ptr.vmem [resolvable:$true] %s106_s23 }
  0x11   : > { %s818_s27 = scalar_lea.hbm %s1205_s0, 1024 }
  0x12   : > { %s1214_s21 = scalar_select %p1051_p11, 1, 0 }
  0x13   : > { %p687_p12 = pneg %p1051_p11  ;;  %p819_p0 = scmp.ne.s32.totalorder %s1205_s0, %s818_s27 }
  0x14   : > { %p825_p6 = scmp.lt.u32.totalorder %s818_s27, %s1205_s0 }
  0x15   : > { %p1059_p13 = pnand %p687_p12, %p1208_p5 }
  0x17   : > { %p820_p1 = pneg %p1059_p13 }
  0x19   : > { %p821_p2 = pnand %p820_p1, %p819_p0 }
  0x1b   : > { %p822_p3 = pneg %p821_p2 }
  0x1d   : > { %p827_p7 = pnand %p825_p6, %p822_p3 }
  0x1f   : > { %830 = shalt.err (!%p827_p7)
}
  0x20   : > { %s831_s4 = scalar_lea.vmem %s107_s23, 1024  ;;  %p839_p10 = scmp.lt.s32.totalorder %s107_s23, %s107_s23 }
  0x21   : > { %p832_p9 = scmp.ne.s32.totalorder %s107_s23, %s831_s4  ;;  %p840_p8 = scmp.lt.s32.totalorder %s831_s4, %s831_s4 }
  0x23   : > { %p834_p12 = pnand %p832_p9, %p820_p1  ;;  %p841_p11 = por %p840_p8, %p839_p10 }
  0x25   : > { %p835_p5 = pneg %p834_p12 }
  0x27   : > { %p842_p4 = pnand %p841_p11, %p835_p5 }
  0x29   : > { %845 = shalt.err (!%p842_p4)
}
  0x2a   : > { %s979_s5 = smov 64   ;;  %s980_s6 = smov 4  }
  0x2b   : > { %690 = dma.hbm_to_vmem [thread:$0]  (!%p1059_p13), %s1205_s0, 1024, %s107_s23, [#allocation3], %s979_s5, %s979_s5, %s980_s6  }
  0x2c   : > { %p609_p0 = scmp.ge.s32.totalorder %s944_s12, 2 }
  0x2d   : > { %p1216_p2 = scmp.ne.s32.totalorder (!%p609_p0), %s1211_s18, 0 }
  0x2e   : > { %116 = sbr.rel (%p609_p0) target bundleno = 88 (0x58), region = 20 }
  0x35   : > { %119 = sbr.rel (!%p1216_p2) target bundleno = 88 (0x58), region = 24  ;;  %s120_s9 = sand.u32 (%p1216_p2), 1, %s940_s11  }
  0x36   : > { %s611_s15 = sshll.u32 (%p1216_p2), %s944_s12, 2  ;;  %s610_s16 = sshll.u32 (%p1216_p2), %s120_s9, 3 }
  0x37   : > { %s126_s22 = ssub.s32 (%p1216_p2), 6, %s611_s15  ;;  %s1087_s26 = scalar_lea.sflag (%p1216_p2), [#allocation5], %s120_s9 }
  0x38   : > { %p127_p4 = scmp.lt.s32.totalorder (%p1216_p2), %s126_s22, 4  ;;  %s124_s23 = scalar_lea.vmem (%p1216_p2), [#allocation4], %s610_s16 }
  0x3c   : > { %s1230_s22 = smov (!%p127_p4, %s126_s22), 4 }
  0x3d   : > { %s1084_s25 = sshll.u32 %s1230_s22, 5 }
  0x3e   : > { %s131_s24 = ssub.s32 128, %s1084_s25 }
  0x3f   : > { %132 = vsyncadd %s1087_s26, %s131_s24  ;;  %p613_p5 = scmp.ne.s32.totalorder %s1084_s25, 0  ;;  %s648_s18 = sshll.u32 %s944_s12, 7 }
  0x40   : > { %s1095_s29 = scalar_lea.hbm %s1206_s1, %s648_s18  ;;  %s137_s30 = sshll.u32 %s124_s23, 4  ;;  %s1097_s30 = int_to_ptr.vmem [resolvable:$true] %s137_s30 }
  0x41   : > { %s846_s3 = scalar_lea.hbm %s1095_s29, %s1084_s25  ;;  %s850_s12 = scalar_lea.hbm %s1206_s1, 192 }
  0x42   : > { %p847_p8 = scmp.ne.s32.totalorder %s1095_s29, %s846_s3  ;;  %p851_p13 = scmp.lt.u32.totalorder %s1095_s29, %s1206_s1 }
  0x43   : > { %p852_p1 = scmp.lt.u32.totalorder %s850_s12, %s846_s3  ;;  %p854_p6 = scmp.lt.u32.totalorder %s846_s3, %s1095_s29 }
  0x44   : > { %p848_p10 = pnand %p847_p8, %p613_p5 }
  0x45   : > { %p853_p3 = por %p852_p1, %p851_p13 }
  0x46   : > { %p849_p11 = pneg %p848_p10 }
  0x47   : > { %p855_p7 = por %p854_p6, %p853_p3 }
  0x49   : > { %p856_p9 = pnand %p855_p7, %p849_p11 }
  0x4b   : > { %859 = shalt.err (!%p856_p9)
}
  0x4c   : > { %s860_s8 = scalar_lea.vmem %s1097_s30, %s1084_s25  ;;  %s981_s9 = smov [#allocation4]  }
  0x4d   : > { %p861_p12 = scmp.ne.s32.totalorder %s1097_s30, %s860_s8  ;;  %s864_s15 = sshll.u32 %s981_s9, 4  ;;  %s865_s15 = int_to_ptr.vmem [resolvable:$false] %s864_s15 }
  0x4e   : > { %s866_s16 = scalar_lea.vmem %s865_s15, 256  ;;  %p867_p4 = scmp.lt.s32.totalorder %s1097_s30, %s865_s15 }
  0x4f   : > { %p862_p0 = pnand %p861_p12, %p613_p5  ;;  %p868_p8 = scmp.lt.s32.totalorder %s866_s16, %s860_s8 }
  0x51   : > { %p863_p2 = pneg %p862_p0  ;;  %p869_p10 = por %p868_p8, %p867_p4 }
  0x53   : > { %p870_p13 = pnand %p869_p10, %p863_p2 }
  0x55   : > { %873 = shalt.err (!%p870_p13)
}
  0x56   : > { %s982_s22 = smov 32   ;;  %s983_s24 = smov 2  }
  0x57   : > { %143 = dma.hbm_to_vmem [thread:$0]  (%p613_p5), %s1095_s29, %s1084_s25, %s1097_s30, %s1087_s26, %s982_s22, %s982_s22, %s983_s24  }
  0x58 PF: > { %p1217_p11 = scmp.ne.s32.totalorder %s1214_s21, 0 }
  0x59   : > { %p1218_p1 = scmp.eq.s32.totalorder (!%p1217_p11), %s1018_s13, 0 }
  0x5a   : > { %149 = sbr.rel (%p1217_p11) target bundleno = 572 (0x23c), region = 28 }
  0x61   : > { %923 = dma.done.wait (%p1218_p1), [#allocation3], 1024   ;;  %p1219_p3 = pmov %p1218_p1 }
  0x62   : > { %s1131_s23 = sand.u32 1, %s936_s10   ;;  %p1220_p5 = scmp.ne.s32.totalorder %s1212_s19, 0 }
  0x63   : > { %925 = vsyncadd (%p1219_p3), [#allocation3], 4294966272  ;;  %s619_s18 = sshll.u32 %s1131_s23, 3  ;;  %s156_s27 = scalar_lea.sflag [#allocation5], %s1131_s23 }
  0x64   : > { %s159_s25 = scalar_lea.vmem [#allocation4], %s619_s18 }
  0x65   : > { %927 = dma.done.wait (%p1220_p5), %s156_s27, 128  }
  0x66   : > { %929 = vsyncadd (%p1220_p5), %s156_s27, 4294967168  ;;  %v794_v0 = vld [vmem:[#allocation2] sm:$0xff]   ;;  %v795_v1 = vld [vmem:[#allocation2 + $0x8] sm:$0xff]   ;;  %s620_s19 = sshll.u32 %s1131_s23, 5  ;;  %vm351_vm0 = vcmask 7168   ;;  %p1221_p6 = scmp.ne.s32.totalorder %s1213_s20, 0 }
  0x67   : > { %662 = vmatprep.subr.bf16.mxu0 %v794_v0  ;;  %v796_v2 = vld [vmem:[#allocation2 + $0x10] sm:$0xff]   ;;  %v797_v3 = vld [vmem:[#allocation2 + $0x18] sm:$0xff]   ;;  %v190_v4 = vld [vmem:[%s159_s25] sm:$0x3]  ;;  %s1140_s21 = scalar_lea.vmem [#allocation6], %s620_s19   ;;  %s632_s26 = sshll.u32 (%p1221_p6), %s1018_s13, 2 }
  0x68   : > { %663 = vmatpush3.bf16.msra.mxu0 %v794_v0  ;;  %v191_v5 = vld [vmem:[%s159_s25 + $0x2] sm:$0x3]  ;;  %v194_v6 = vunpack.c.l.s8.bf16 %v190_v4  ;;  %v800_v11 = vld [vmem:[#allocation2 + $0x30] sm:$0xff]   ;;  %v192_v12 = vld [vmem:[%s159_s25 + $0x4] sm:$0x3]  ;;  %s649_s28 = sshll.u32 (%p1221_p6), %s1018_s13, 5 }
  0x69   : > { %664 = vmatprep.subr.bf16.mxu0 %v795_v1  ;;  %v195_v7 = vunpack.c.l.s8.bf16 %v191_v5  ;;  %v798_v9 = vld [vmem:[#allocation2 + $0x20] sm:$0xff]   ;;  %v799_v10 = vld [vmem:[#allocation2 + $0x28] sm:$0xff]   ;;  %v801_v14 = vld [vmem:[#allocation2 + $0x38] sm:$0xff]   ;;  %v196_v15 = vunpack.c.l.s8.bf16 %v192_v12  ;;  %s364_s29 = ssub.s32 (%p1221_p6), 6, %s632_s26  ;;  %s1153_s4 = scalar_lea.vmem (%p1221_p6), %s1207_s2, %s649_s28  }
  0x6a   : > { %v193_v13 = vld [vmem:[%s159_s25 + $0x6] sm:$0x3]  ;;  %p365_p7 = scmp.lt.s32.totalorder (%p1221_p6), %s364_s29, 4 }
  0x6b   : > { %v621_v8 = vcombine.low %v194_v6, %v195_v7  ;;  %v197_v16 = vunpack.c.l.s8.bf16 %v193_v13 }
  0x6c   : > { %665 = vmatpush3.bf16.msra.mxu0 %v795_v1 }
  0x6d   : > { %666 = vmatprep.subr.bf16.mxu0 %v796_v2  ;;  %678 = vmatprep.mubr.bf16.mxu0 %v621_v8  ;;  %v622_v17 = vcombine.low %v196_v15, %v197_v16 }
  0x70   : > { %667 = vmatpush3.bf16.msra.mxu0 %v796_v2 }
  0x71   : > { %668 = vmatprep.subr.bf16.mxu0 %v797_v3 }
  0x74   : > { %669 = vmatpush3.bf16.msra.mxu0 %v797_v3 }
  0x75   : > { %670 = vmatprep.subr.bf16.mxu0 %v798_v9 }
  0x78   : > { %671 = vmatpush3.bf16.msra.mxu0 %v798_v9 }
  0x79   : > { %672 = vmatprep.subr.bf16.mxu0 %v799_v10 }
  0x7c   : > { %673 = vmatpush3.bf16.msra.mxu0 %v799_v10 }
  0x7d   : > { %674 = vmatprep.subr.bf16.mxu0 %v800_v11 }
  0x80   : > { %675 = vmatpush3.bf16.msra.mxu0 %v800_v11 }
  0x81   : > { %676 = vmatprep.subr.bf16.mxu0 %v801_v14 }
  0x84   : > { %677 = vmatpush3.bf16.msra.mxu0 %v801_v14 }
  0x87   : > { %679 = vmatmul.mubr.bf16.vlgmr.msra.gmra.mrb[0].mxu0 %v622_v17 }
 0x15a   : > { %v680_v18 = vpop.f32.mrb[0].mxu0 }
 0x15b   : > { %327 = vadd.xlane.f32.xlu1 %v680_v18  ;;  %v308_v19 = vpop.f32.mrb[1].mxu0 }
 0x15c   : > { %323 = vadd.xlane.f32.xlu0 %v308_v19  ;;  %v681_v20 = vpop.f32.mrb[2].mxu0 }
 0x15d   : > { %v311_v21 = vpop.f32.mrb[3].mxu0 }
 0x15f   : > { %329 = vadd.xlane.f32.xlu1 %v681_v20 }
 0x160   : > { %325 = vadd.xlane.f32.xlu0 %v311_v21 }
 0x1e8   : > { %v328_v22 = vpop.xlane.xlu1 %327 }
 0x1e9   : > { %v333_v23 = vsub.f32 0.0, %v328_v22  ;;  %v324_v24 = vpop.xlane.xlu0 %323 }
 0x1ea   : > { %v331_v25 = vsub.f32 0.0, %v324_v24 }
 0x1eb   : > { %v339_v26 = vmul.f32 1.442695, %v333_v23 }
 0x1ec   : > { %v335_v27 = vmul.f32 1.442695, %v331_v25  ;;  %v330_v28 = vpop.xlane.xlu1 %329 }
 0x1ed   : > { %802 = vpow2.f32 %v339_v26  ;;  %v334_v29 = vsub.f32 0.0, %v330_v28  ;;  %v326_v30 = vpop.xlane.xlu0 %325 }
 0x1ee   : > { %804 = vpow2.f32 %v335_v27  ;;  %v332_v31 = vsub.f32 0.0, %v326_v30 }
 0x1ef   : > { %v341_v32 = vmul.f32 1.442695, %v334_v29 }
 0x1f0   : > { %v337_v33 = vmul.f32 1.442695, %v332_v31 }
 0x1f1   : > { %806 = vpow2.f32 %v341_v32 }
 0x1f2   : > { %808 = vpow2.f32 %v337_v33 }
 0x1f7   : > { %v803_v34 = vpop.eup %802 }
 0x1f8   : > { %v805_v35 = vpop.eup %804  ;;  %v345_v36 = vadd.f32 1.0, %v803_v34 }
 0x1f9   : > { %v343_v37 = vadd.f32 1.0, %v805_v35 }
 0x1fa   : > { %810 = vrcp.f32 %v345_v36 }
 0x1fb   : > { %v807_v38 = vpop.eup %806  ;;  %812 = vrcp.f32 %v343_v37 }
 0x1fc   : > { %v809_v39 = vpop.eup %808  ;;  %v346_v40 = vadd.f32 1.0, %v807_v38 }
 0x1fd   : > { %v344_v41 = vadd.f32 1.0, %v809_v39 }
 0x1fe   : > { %814 = vrcp.f32 %v346_v40 }
 0x1ff   : > { %816 = vrcp.f32 %v344_v41 }
 0x204   : > { %v811_v42 = vpop.eup %810  ;;  %362 = sbr.rel (!%p1221_p6) target bundleno = 572 (0x23c), region = 40 }
 0x205   : > { %v813_v43 = vpop.eup %812  ;;  %354 = vst.msk [vmem:[%s1140_s21 + $0x10] sm:$0xff] %vm351_vm0, %v811_v42 }
 0x206   : > { %352 = vst.msk [vmem:[%s1140_s21] sm:$0xff] %vm351_vm0, %v813_v43 }
 0x208   : > { %v815_v44 = vpop.eup %814 }
 0x209   : > { %v817_v45 = vpop.eup %816  ;;  %355 = vst.msk [vmem:[%s1140_s21 + $0x18] sm:$0xff] %vm351_vm0, %v815_v44 }
 0x20a   : > { %353 = vst.msk [vmem:[%s1140_s21 + $0x8] sm:$0xff] %vm351_vm0, %v817_v45 }
 0x20b   : > { %s1232_s29 = smov (!%p365_p7, %s364_s29), 4 }
 0x20c   : > { %s633_s5 = sshll.u32 %s1232_s29, 7 }
 0x20d   : > { %p636_p9 = scmp.eq.s32.totalorder %s633_s5, 0 }
 0x20e   : > { %s1159_s20 = sshrl.u32 (!%p636_p9), %s1232_s29, 2 }
 0x20f   : > { %373 = sbr.rel (%p636_p9) target bundleno = 572 (0x23c), region = 44  ;;  %p637_p12 = scmp.le.s32.totalorder (!%p636_p9), %s1159_s20, 0 }
 0x216   : > { %550 = sbr.rel (%p637_p12) target bundleno = 551 (0x227), region = 127  ;;  %s1222_s13 = smov (!%p637_p12), %s1153_s4 }
 0x217   : > { %s1223_s12 = smov (!%p637_p12), %s1140_s21  ;;  %s1168_s6 = smov (!%p637_p12), 0  }
 0x218   : > { %s958_s7 = smov (!%p637_p12), 0  }
 0x21d LB: >> { %v441_v46 = vld [vmem:[%s952_s12] sm:$0xff]  ;;  %v443_v47 = vld [vmem:[%s952_s12 + $0x8] sm:$0xff]  ;;  %v445_v48 = vld [vmem:[%s952_s12 + $0x10] sm:$0xff]  ;;  %s449_s8 = sadd.s32 1, %s956_s6  ;;  %s435_s7 = sadd.s32 1, %s960_s7   ;;  %s960_s7 = sphi %s958_s7, %s435_s7   ;;  %s956_s6 = sphi %s1168_s6, %s1224_s6   ;;  %s952_s12 = sphi %s1223_s12, %s454_s12   ;;  %s948_s13 = sphi %s1222_s13, %s455_s13  }
 0x21e   : >> { %442 = vst [vmem:[%s948_s13] sm:$0xff] %v441_v46  ;;  %444 = vst [vmem:[%s948_s13 + $0x8] sm:$0xff] %v443_v47  ;;  %v447_v49 = vld [vmem:[%s952_s12 + $0x18] sm:$0xff]  ;;  %p450_p0 = scmp.ge.s32.totalorder %s449_s8, %s1159_s20  ;;  %p434_p2 = scmp.ge.s32.totalorder %s435_s7, %s1159_s20 }
 0x21f   : >> { %446 = vst [vmem:[%s948_s13 + $0x10] sm:$0xff] %v445_v48  ;;  %448 = vst [vmem:[%s948_s13 + $0x18] sm:$0xff] %v447_v49 }
 0x220   : >> { %s1234_s8 = smov (%p450_p0, %s449_s8), 0  ;;  %437 = sbr.rel (!%p434_p2) target bundleno = 541 (0x21d), region = 133 }
 0x221   : >> { %s638_s9 = sshll.u32 %s1234_s8, 5  ;;  %s1224_s6 = smov %s1234_s8 }
 0x222   : >> { %s454_s12 = scalar_lea.vmem %s1140_s21, %s638_s9 [#allocation6]   ;;  %s455_s13 = scalar_lea.vmem %s1153_s4, %s638_s9  }
 0x227 PF: > { %s1184_s15 = sand.u32 3, %s1232_s29   ;;  %s650_s16 = sshll.u32 %s1159_s20, 5 }
 0x228   : > { %s460_s22 = scalar_lea.vmem %s1140_s21, %s650_s16 [#allocation6]   ;;  %s462_s24 = scalar_lea.vmem %s1153_s4, %s650_s16  }
 0x229   : > { %p643_p4 = scmp.le.s32.totalorder %s1184_s15, 0 }
 0x22a   : > { %s962_s23 = smov (!%p643_p4), %s462_s24   ;;  %s966_s18 = smov (!%p643_p4), %s460_s22  }
 0x22b   : > { %564 = sbr.rel (%p643_p4) target bundleno = 572 (0x23c), region = 138  ;;  %s970_s27 = smov (!%p643_p4), 0  }
 0x22c   : > { %s974_s25 = smov (!%p643_p4), 0  }
 0x232 LB: >> { %v472_v50 = vld [vmem:[%s968_s18] sm:$0xff]  ;;  %s474_s19 = sadd.s32 1, %s972_s27  ;;  %s466_s25 = sadd.s32 1, %s976_s25   ;;  %s976_s25 = sphi %s974_s25, %s466_s25   ;;  %s972_s27 = sphi %s970_s27, %s971_s27   ;;  %s968_s18 = sphi %s966_s18, %s479_s18   ;;  %s964_s23 = sphi %s962_s23, %s480_s23  }
 0x233   : >> { %473 = vst [vmem:[%s964_s23] sm:$0xff] %v472_v50  ;;  %p475_p8 = scmp.ge.s32.totalorder %s474_s19, %s1184_s15  ;;  %p465_p10 = scmp.ge.s32.totalorder %s466_s25, %s1184_s15 }
 0x235   : >> { %s1236_s19 = smov (%p475_p8, %s474_s19), 0  ;;  %468 = sbr.rel (!%p465_p10) target bundleno = 562 (0x232), region = 144 }
 0x236   : >> { %s644_s21 = sshll.u32 %s1236_s19, 3  ;;  %s971_s27 = smov %s1236_s19  }
 0x237   : >> { %s479_s18 = scalar_lea.vmem %s460_s22, %s644_s21 [#allocation6]   ;;  %s480_s23 = scalar_lea.vmem %s462_s24, %s644_s21  }
 0x23c PF: > { %p13_p13 = scmp.ge.s32.totalorder %s1021_s14, 4   ;;  %s1225_s9 = smov %s936_s10 }
 0x23d   : > { %s1226_s10 = smov %s940_s11  ;;  %s1227_s11 = smov %s1031_s17 }
 0x23e   : > { %s1228_s12 = smov %s1021_s14  ;;  %15 = sbr.rel (!%p13_p13) target bundleno = 4 (0x4), region = 155 }
 0x245   :  { %496 = vsyncpa [#allocation3], 1 }
 0x246   :  { %498 = vsyncpa [#allocation3 + $0x1], 1 }
 0x247   :  { %499 = vsyncpa [#allocation5], 1 }
 0x248   :  { %501 = vsyncpa [#allocation5 + $0x1], 1 }

</bundles_post_ra>
